<compile_context>
chip_gen: v7x
topology: tpu7x:2x2x1
jax: 0.10.0
libtpu: 0.0.40
codegen_flags: <defaults>
</compile_context>

<pallas_src>
import functools

import jax
import jax.numpy as jnp
from jax.experimental import pallas as pl
from jax.experimental.pallas import tpu as pltpu

_LANES = 128              # vreg lane width
_MAX_ROW_TILE = 256       # sublane-axis tile over flattened N*C rows
_MAX_SPATIAL_TILE = 4096  # lane-axis tile over flattened H*W (multiple of 128)


def _round_up(a, b):
    return (a + b - 1) // b * b


def _gap_kernel(x_ref, o_ref, acc_ref, *, inv_hw):
    """Accumulate row-wise partial sums of one (TR, TS) chunk."""
    k = pl.program_id(1)

    @pl.when(k == 0)
    def _init():
        acc_ref[...] = jnp.zeros_like(acc_ref)

    ts = x_ref.shape[-1]
    # Fold TS lanes down to a (TR, 128) partial sum with elementwise VPU adds over
    # lane-aligned static 128-wide column slices (no per-chunk cross-lane reduce).
    partial = x_ref[:, 0:_LANES].astype(jnp.float32)
    for i in range(1, ts // _LANES):
        partial = partial + x_ref[:, i * _LANES:(i + 1) * _LANES].astype(jnp.float32)
    acc_ref[...] += partial

    @pl.when(k == pl.num_programs(1) - 1)
    def _finalize():
        # One cross-lane reduce per row tile; normalize by the true H*W once.
        row_sum = jnp.sum(acc_ref[...], axis=-1, keepdims=True)  # (TR, 1)
        o_ref[...] = (row_sum * inv_hw).astype(o_ref.dtype)


def _global_avg_pool_pallas(x):
    N, C, H, W = x.shape
    R, S = N * C, H * W

    itemsize = jnp.dtype(x.dtype).itemsize
    sub = max(8, 32 // itemsize)  # 8 (f32) / 16 (bf16) / 32 (int8) sublane multiple

    tr = min(_MAX_ROW_TILE, _round_up(R, sub))
    ts = min(_MAX_SPATIAL_TILE, _round_up(S, _LANES))
    r_pad = _round_up(R, tr)
    s_pad = _round_up(S, ts)

    x2 = x.reshape(R, S)  # layout plumbing only
    if (r_pad, s_pad) != (R, S):
        # zero padding cannot perturb the sum; divisor below is the true H*W
        x2 = jnp.pad(x2, ((0, r_pad - R), (0, s_pad - S)))

    kernel = functools.partial(_gap_kernel, inv_hw=float(1.0 / S))

    out = pl.pallas_call(
        kernel,
        out_shape=jax.ShapeDtypeStruct((r_pad, 1), x.dtype),
        grid_spec=pltpu.PrefetchScalarGridSpec(
            num_scalar_prefetch=0,
            grid=(r_pad // tr, s_pad // ts),
            in_specs=[pl.BlockSpec((tr, ts), lambda r, k: (r, k))],
            out_specs=pl.BlockSpec((tr, 1), lambda r, k: (r, 0)),
            scratch_shapes=[pltpu.VMEM((tr, _LANES), jnp.float32)],
        ),
        compiler_params=pltpu.CompilerParams(
            dimension_semantics=("parallel", "arbitrary"),
            vmem_limit_bytes=32 * 1024 * 1024,
        ),
    )(x2)

    return out[:R, 0].reshape(N, C)


def global_avg_pool(x, *, force_pallas=True):
    """x: (N, C, H, W) -> (N, C), mean over spatial dims."""
    N, C, H, W = x.shape
    # For truly tiny inputs, fixed pallas_call / per-step overhead dominates and
    # XLA's fused reduction is faster; bypass is opt-out so tests still exercise
    # the kernel.
    if not force_pallas and N * C * H * W < (1 << 18):
        return jnp.mean(x, axis=(2, 3)).astype(x.dtype)
    return _global_avg_pool_pallas(x)


if __name__ == "__main__":
    key = jax.random.PRNGKey(0)
    k1, k2, k3 = jax.random.split(key, 3)

    # primary small test, consistent with an NCHW conv feature map
    x = jax.random.normal(k1, (2, 4, 16, 16), dtype=jnp.float32)
    y = jax.block_until_ready(global_avg_pool(x))
    y_ref = jnp.mean(x, axis=(2, 3))
    assert y.shape == (2, 4), y.shape
    assert jnp.allclose(y, y_ref, atol=1e-5, rtol=1e-5), "mismatch vs reference"

    # non-aligned shape: exercises the zero-padded remainder path
    x2 = jax.random.normal(k2, (2, 3, 7, 9), dtype=jnp.float32)
    y2 = jax.block_until_ready(global_avg_pool(x2))
    assert jnp.allclose(y2, jnp.mean(x2, axis=(2, 3)), atol=1e-5, rtol=1e-5)

    # H*W larger than the spatial tile: exercises multi-step accumulation
    x3 = jax.random.normal(k3, (1, 8, 64, 80), dtype=jnp.float32)
    y3 = jax.block_until_ready(global_avg_pool(x3))
    assert jnp.allclose(y3, jnp.mean(x3, axis=(2, 3)), atol=1e-5, rtol=1e-5)

    print("KERNEL_OK")
</pallas_src>

<mosaic_0001>
module attributes {stable_mosaic.version = 11 : i64} {
  func.func @_gap_kernel(%arg0: i32, %arg1: i32, %arg2: memref<8x256xf32, #tpu.memory_space<vmem>>, %arg3: memref<8x1xf32, #tpu.memory_space<vmem>>, %arg4: memref<8x128xf32, #tpu.memory_space<vmem>>) attributes {dimension_semantics = [#tpu.dimension_semantics<parallel>, #tpu.dimension_semantics<arbitrary>], iteration_bounds = array<i64: 1, 1>, scalar_prefetch = 0 : i64, scratch_operands = 1 : i64, tpu.core_type = #tpu.core_type<tc>, window_params = [{transform_indices = @transform_0, window_bounds = array<i64: 8, 256>}, {transform_indices = @transform_1, window_bounds = array<i64: 8, 1>}]} {
    %c0_i32 = arith.constant 0 : i32
    %0 = arith.cmpi eq, %arg1, %c0_i32 : i32
    %1 = arith.extui %0 : i1 to i32
    %c0_i32_0 = arith.constant 0 : i32
    %2 = arith.cmpi ne, %1, %c0_i32_0 : i32
    scf.if %2 {
      %cst = arith.constant 0.000000e+00 : f32
      %12 = vector.broadcast %cst : f32 to vector<8x128xf32>
      %c0_9 = arith.constant 0 : index
      %c0_10 = arith.constant 0 : index
      %13 = vector.load %arg4[%c0_9, %c0_10] : memref<8x128xf32, #tpu.memory_space<vmem>>, vector<8x128xf32>
      tpu.vector_store %arg4[%c0_9, %c0_10], %12 {strides = array<i32>} : memref<8x128xf32, #tpu.memory_space<vmem>>, vector<8x128xf32>,
    } else {
    }
    %c0 = arith.constant 0 : index
    %c0_1 = arith.constant 0 : index
    %3 = vector.load %arg2[%c0, %c0_1] : memref<8x256xf32, #tpu.memory_space<vmem>>, vector<8x128xf32>
    %c0_2 = arith.constant 0 : index
    %c128 = arith.constant 128 : index
    %4 = vector.load %arg2[%c0_2, %c128] : memref<8x256xf32, #tpu.memory_space<vmem>>, vector<8x128xf32>
    %5 = arith.addf %3, %4 : vector<8x128xf32>
    %c0_3 = arith.constant 0 : index
    %c0_4 = arith.constant 0 : index
    %6 = vector.load %arg4[%c0_3, %c0_4] : memref<8x128xf32, #tpu.memory_space<vmem>>, vector<8x128xf32>
    %7 = arith.addf %6, %5 : vector<8x128xf32>
    %c0_5 = arith.constant 0 : index
    %c0_6 = arith.constant 0 : index
    %8 = vector.load %arg4[%c0_5, %c0_6] : memref<8x128xf32, #tpu.memory_space<vmem>>, vector<8x128xf32>
    tpu.vector_store %arg4[%c0_5, %c0_6], %7 {strides = array<i32>} : memref<8x128xf32, #tpu.memory_space<vmem>>, vector<8x128xf32>,
    %c0_i32_7 = arith.constant 0 : i32
    %9 = arith.cmpi eq, %arg1, %c0_i32_7 : i32
    %10 = arith.extui %9 : i1 to i32
    %c0_i32_8 = arith.constant 0 : i32
    %11 = arith.cmpi ne, %10, %c0_i32_8 : i32
    scf.if %11 {
      %c0_9 = arith.constant 0 : index
      %c0_10 = arith.constant 0 : index
      %12 = vector.load %arg4[%c0_9, %c0_10] : memref<8x128xf32, #tpu.memory_space<vmem>>, vector<8x128xf32>
      %cst = arith.constant dense<0.000000e+00> : vector<8xf32>
      %13 = vector.multi_reduction <add>, %12, %cst [1] : vector<8x128xf32> to vector<8xf32>
      %14 = vector.shape_cast %13 : vector<8xf32> to vector<8x1xf32>
      %cst_11 = arith.constant 3.906250e-03 : f32
      %15 = vector.broadcast %cst_11 : f32 to vector<8x1xf32>
      %16 = arith.mulf %14, %15 : vector<8x1xf32>
      %c0_12 = arith.constant 0 : index
      %c0_13 = arith.constant 0 : index
      %17 = vector.load %arg3[%c0_12, %c0_13] : memref<8x1xf32, #tpu.memory_space<vmem>>, vector<8x1xf32>
      tpu.vector_store %arg3[%c0_12, %c0_13], %16 {strides = array<i32>} : memref<8x1xf32, #tpu.memory_space<vmem>>, vector<8x1xf32>,
    } else {
    }
    return
  }
  func.func @transform_0(%arg0: i32, %arg1: i32) -> (i32, i32) {
    %c0_i32 = arith.constant 0 : i32
    return %arg0, %arg1 : i32, i32
  }
  func.func @transform_1(%arg0: i32, %arg1: i32) -> (i32, i32) {
    %c0_i32 = arith.constant 0 : i32
    %c0_i32_0 = arith.constant 0 : i32
    return %arg0, %c0_i32 : i32, i32
  }
}

</mosaic_0001>

<bundles_post_ra>
// kernel: tpu_custom_call.1
= control target key start
LH: loop header
LB: loop body
LE: loop exit
PB: predicated region body
PF: predicated region fallthrough
CT: control target
= control target key end

     0   :  { %6 = vsyncpa [#allocation4], 0  ;;  %s70_s6 = smov [#allocation3]   ;;  %s96_s0 = inlined_call_operand.hbm [shape: f32[8,256], index: 0, kind: input, shape index: {}]   ;;  %s97_s1 = inlined_call_operand.vmem [shape: f32[8,1], index: 1, kind: output, shape index: {}]  }
   0x1   :  { %s13_s7 = sshll.u32 %s70_s6, 4  ;;  %s46_s10 = scalar_lea.hbm %s96_s0, 256  ;;  %s14_s7 = int_to_ptr.vmem [resolvable:$true] %s13_s7 }
   0x2   :  { %p47_p0 = scmp.ne.s32.totalorder %s96_s0, %s46_s10  ;;  %p50_p1 = scmp.lt.u32.totalorder %s46_s10, %s96_s0 }
   0x4   :  { %p52_p2 = pnand %p50_p1, %p47_p0 }
   0x6   :  { %55 = shalt.err (!%p52_p2)
}
   0x7   :  { %s56_s15 = scalar_lea.vmem %s14_s7, 256  ;;  %p61_p4 = scmp.lt.s32.totalorder %s14_s7, %s14_s7 }
   0x8   :  { %p57_p3 = scmp.ne.s32.totalorder %s14_s7, %s56_s15  ;;  %p62_p5 = scmp.lt.s32.totalorder %s56_s15, %s56_s15 }
   0xa   :  { %p63_p6 = por %p62_p5, %p61_p4 }
   0xc   :  { %p64_p7 = pnand %p63_p6, %p57_p3 }
   0xe   :  { %67 = shalt.err (!%p64_p7)
}
   0xf   :  { %16 = dma.hbm_to_vmem [thread:$0]  %s96_s0, 256, %s14_s7, [#allocation4]  }
  0x10   :  { %68 = dma.done.wait [#allocation4], 256  }
  0x11   :  { %69 = vsyncadd [#allocation4], 4294967040  ;;  %v25_v0 = vld [vmem:[#allocation3] sm:$0xff]  ;;  %v26_v1 = vld [vmem:[#allocation3 + $0x8] sm:$0xff]  ;;  %vm38_vm0 = vcmask 7168  }
  0x12   :  { %v27_v2 = vadd.f32 %v26_v1, %v25_v0 }
  0x14   :  { %35 = vadd.xlane.f32.xlu0 %v27_v2 }
  0xa1   :  { %v36_v3 = vpop.xlane.xlu0 %35 }
  0xa2   :  { %v37_v4 = vmul.f32 0.00390625, %v36_v3 }
  0xa4   :  { %39 = vst.msk [vmem:[%s97_s1] sm:$0xff] %vm38_vm0, %v37_v4 }
  0xa5   :  { %44 = vsyncpa [#allocation4], 1 }

</bundles_post_ra>
